<compile_context>
chip_gen: v5e
topology: v5e:2x2
jax: 0.10.0
libtpu: 0.0.40
codegen_flags: <defaults>
</compile_context>

<pallas_src>
import math

import jax
import jax.numpy as jnp
from jax.experimental import pallas as pl
from jax.experimental.pallas import tpu as pltpu


def _round_up(x, m):
    return ((x + m - 1) // m) * m


def _query_vmem_budget():
    """~75% of physical VMEM per TensorCore, capped at 100 MiB.
    v5e/v6e (128 MiB) -> 96 MiB, v7x (64 MiB) -> 48 MiB.  Falls back to a
    conservative 48 MiB if the hardware query is unavailable."""
    phys = None
    try:
        info = pltpu.get_tpu_info()
        phys = getattr(info, "vmem_capacity_bytes", None)
    except Exception:
        phys = None
    if not phys or phys <= 0:
        phys = 64 * 1024 * 1024
    return int(min(phys * 3 // 4, 100 * 1024 * 1024))


def _select_row_tile(M, sub, tm_cap):
    """Row tile aligned to the dtype sublane packing, preferring divisors of M
    (no activation padding, 256-aligned first for the 256x256 MXU), and kept
    small enough that there are >= 2 row tiles whenever M allows (v7x)."""
    M_sub = _round_up(M, sub)
    cap = max(sub, min((tm_cap // sub) * sub, M_sub))
    if M_sub >= 2 * sub:                       # leave >=2 tiles for megacore
        half = _round_up(-(-M_sub // 2), sub)
        cap = max(sub, min(cap, half))
    # Largest aligned tile that divides M exactly (no padding / no jnp.pad).
    for align in (256, 128, sub):
        t = (cap // align) * align
        while t >= align:
            if M % t == 0:
                return t, M
            t -= align
    # Otherwise: largest aligned tile with acceptable padding waste.
    t = (cap // sub) * sub
    while t > sub:
        pad = _round_up(M, t) - M
        if pad <= max(M // 8, sub):
            return t, M + pad
        t -= sub
    return sub, _round_up(M, sub)


def _select_hidden_tile(d_ff, tf_cap):
    """d_ff slab size: prefers 256-aligned divisors (v6e/v7x 2x256x256 MXU),
    then 128-aligned (v5e 4x128x128); if no aligned divisor exists, d_ff is
    zero-padded to a multiple of the slab (mathematically inert)."""
    if d_ff <= tf_cap:
        return d_ff, d_ff
    for align in (256, 128):
        t = (min(tf_cap, d_ff) // align) * align
        while t >= align:
            if d_ff % t == 0:
                return t, d_ff
            t -= align
    t = max(256, (tf_cap // 256) * 256) if tf_cap >= 256 else 128
    return t, _round_up(d_ff, t)


def ffn_kernel_resident(x_ref, w1_ref, b1_ref, w2_ref, b2_ref, o_ref):
    """Weights fully VMEM-resident: one pass per row tile, no accumulator."""
    h = jnp.dot(x_ref[...], w1_ref[...], preferred_element_type=jnp.float32)
    h = jnp.maximum(h + b1_ref[...].astype(jnp.float32), 0.0)
    y = jnp.dot(h.astype(w2_ref.dtype), w2_ref[...],
                preferred_element_type=jnp.float32)
    o_ref[...] = (y + b2_ref[...].astype(jnp.float32)).astype(o_ref.dtype)


def ffn_kernel_slab(x_ref, w1_ref, b1_ref, w2_ref, b2_ref, o_ref, acc_ref):
    """One (row-tile, d_ff-slab) step; f32 accumulation over the d_ff axis."""
    k = pl.program_id(1)

    h = jnp.dot(x_ref[...], w1_ref[...], preferred_element_type=jnp.float32)
    h = jnp.maximum(h + b1_ref[...].astype(jnp.float32), 0.0)
    part = jnp.dot(h.astype(w2_ref.dtype), w2_ref[...],
                   preferred_element_type=jnp.float32)

    @pl.when(k == 0)
    def _init():                      # fold init into the first slab (no zero-store)
        acc_ref[...] = part

    @pl.when(k != 0)
    def _accum():
        acc_ref[...] += part

    @pl.when(k == pl.num_programs(1) - 1)
    def _finalize():
        out = acc_ref[...] + b2_ref[...].astype(jnp.float32)
        o_ref[...] = out.astype(o_ref.dtype)


def positionwise_feed_forward(x, w1, b1, w2, b2, *, tm=1024, tf=2048,
                              vmem_budget_bytes=None, force_slab=False):
    """x: (B, S, d_model).  w1: (d_model, d_ff), b1: (1, d_ff),
    w2: (d_ff, d_model), b2: (1, d_model) — weights already transposed from
    nn.Linear's (out, in) storage.

    For best MXU throughput on v6e/v7x pass x / weights / biases as bfloat16;
    accumulation and the relu/bias epilogue stay float32 inside the kernel
    (h is downcast to the weight dtype before the second matmul — standard
    mixed-precision behavior)."""
    B, S, d_model = x.shape
    d_ff = w1.shape[1]
    assert w1.shape == (d_model, d_ff)
    assert w2.shape == (d_ff, d_model)
    assert b1.shape == (1, d_ff) and b2.shape == (1, d_model)

    M = B * S
    x2 = x.reshape(M, d_model)

    x_isz = jnp.dtype(x.dtype).itemsize
    w_isz = jnp.dtype(w1.dtype).itemsize
    sub = max(8, 32 // x_isz)          # sublane packing: f32->8, bf16->16, int8->32

    budget = (int(vmem_budget_bytes) if vmem_budget_bytes is not None
              else _query_vmem_budget())

    def resident_bytes(tm_):
        return (4 * tm_ * d_model * x_isz                       # x + out (2x buf)
                + 2 * (d_model * d_ff + d_ff) * w_isz            # W1 + b1
                + 2 * (d_ff * d_model + d_model) * w_isz         # W2 + b2
                + tm_ * d_ff * 4                                 # hidden (f32)
                + tm_ * d_model * 4)                             # f32 result

    def slab_bytes(tm_, tf_):
        return (4 * tm_ * d_model * x_isz
                + 2 * (d_model * tf_ + tf_) * w_isz
                + 2 * (tf_ * d_model + d_model) * w_isz
                + tm_ * d_model * 4                              # acc scratch
                + tm_ * tf_ * 4                                  # hidden slab
                + tm_ * d_model * 4)

    tm_pref = max(sub, _round_up(tm, sub))
    resident = (not force_slab) and resident_bytes(sub) <= budget

    if resident:
        tm_cap = tm_pref
        while tm_cap > sub and resident_bytes(tm_cap) > budget:
            tm_cap = max(sub, tm_cap // 2)
        tf_eff, d_ff_pad = d_ff, d_ff
    else:
        tf_cap = max(128, _round_up(tf, 128))
        while True:
            tf_eff, d_ff_pad = _select_hidden_tile(d_ff, tf_cap)
            tm_cap = tm_pref
            while tm_cap > sub and slab_bytes(tm_cap, tf_eff) > budget:
                tm_cap = max(sub, tm_cap // 2)
            if slab_bytes(tm_cap, tf_eff) <= budget or tf_cap <= 128:
                break
            tf_cap //= 2

    tm_eff, M_pad = _select_row_tile(M, sub, tm_cap)
    n_m = M_pad // tm_eff

    if M_pad != M:
        x2 = jnp.pad(x2, ((0, M_pad - M), (0, 0)))

    flops = int(4 * M_pad * d_model * d_ff_pad)     # two matmuls, 2 flop per MAC
    w_bytes = ((d_model * d_ff_pad + d_ff_pad)
               + (d_ff_pad * d_model + d_model)) * w_isz

    if resident:
        bytes_accessed = int(2 * M_pad * d_model * x_isz + w_bytes)
        out2 = pl.pallas_call(
            ffn_kernel_resident,
            out_shape=jax.ShapeDtypeStruct((M_pad, d_model), x.dtype),
            grid=(n_m,),
            in_specs=[
                pl.BlockSpec((tm_eff, d_model), lambda i: (i, 0)),   # x rows
                pl.BlockSpec((d_model, d_ff),   lambda i: (0, 0)),   # W1 (resident)
                pl.BlockSpec((1, d_ff),         lambda i: (0, 0)),   # b1
                pl.BlockSpec((d_ff, d_model),   lambda i: (0, 0)),   # W2 (resident)
                pl.BlockSpec((1, d_model),      lambda i: (0, 0)),   # b2
            ],
            out_specs=pl.BlockSpec((tm_eff, d_model), lambda i: (i, 0)),
            compiler_params=pltpu.CompilerParams(
                dimension_semantics=("parallel",),
                vmem_limit_bytes=int(budget)),
            cost_estimate=pl.CostEstimate(flops=flops, transcendentals=0,
                                          bytes_accessed=bytes_accessed),
        )(x2, w1, b1, w2, b2)
    else:
        if d_ff_pad != d_ff:
            # Zero-pad the hidden dim: zero W1 cols / b1 / W2 rows are inert
            # through relu, so the result is unchanged.
            pad_f = d_ff_pad - d_ff
            w1 = jnp.pad(w1, ((0, 0), (0, pad_f)))
            b1 = jnp.pad(b1, ((0, 0), (0, pad_f)))
            w2 = jnp.pad(w2, ((0, pad_f), (0, 0)))
        n_k = d_ff_pad // tf_eff
        bytes_accessed = int(2 * M_pad * d_model * x_isz + n_m * w_bytes)
        out2 = pl.pallas_call(
            ffn_kernel_slab,
            out_shape=jax.ShapeDtypeStruct((M_pad, d_model), x.dtype),
            grid=(n_m, n_k),                       # reduction (d_ff) axis innermost
            in_specs=[
                pl.BlockSpec((tm_eff, d_model), lambda i, k: (i, 0)),   # x rows
                pl.BlockSpec((d_model, tf_eff), lambda i, k: (0, k)),   # W1 slab
                pl.BlockSpec((1, tf_eff),       lambda i, k: (0, k)),   # b1 slab
                pl.BlockSpec((tf_eff, d_model), lambda i, k: (k, 0)),   # W2 slab
                pl.BlockSpec((1, d_model),      lambda i, k: (0, 0)),   # b2
            ],
            out_specs=pl.BlockSpec((tm_eff, d_model), lambda i, k: (i, 0)),
            scratch_shapes=[pltpu.VMEM((tm_eff, d_model), jnp.float32)],
            compiler_params=pltpu.CompilerParams(
                dimension_semantics=("parallel", "arbitrary"),
                vmem_limit_bytes=int(budget)),
            cost_estimate=pl.CostEstimate(flops=flops, transcendentals=0,
                                          bytes_accessed=bytes_accessed),
        )(x2, w1, b1, w2, b2)

    if M_pad != M:
        out2 = out2[:M]
    return out2.reshape(B, S, d_model)


def init_linear_params(key, in_features, out_features, dtype=jnp.float32):
    """Deterministic init mimicking nn.Linear default (uniform +/- 1/sqrt(in)).
    Returns W as (in, out) and b as (1, out)."""
    kw, kb = jax.random.split(key)
    bound = 1.0 / math.sqrt(in_features)
    w = jax.random.uniform(kw, (in_features, out_features), dtype,
                           minval=-bound, maxval=bound)
    b = jax.random.uniform(kb, (1, out_features), dtype,
                           minval=-bound, maxval=bound)
    return w, b


def _ffn_ref(x, w1, b1, w2, b2):
    xf, w1f, b1f, w2f, b2f = (t.astype(jnp.float32) for t in (x, w1, b1, w2, b2))
    return jnp.maximum(xf @ w1f + b1f[0], 0.0) @ w2f + b2f[0]


if __name__ == "__main__":
    key = jax.random.PRNGKey(0)
    k_x, k_w1, k_w2, k_x3, k_w3, k_w4 = jax.random.split(key, 6)

    # Small shapes consistent with the module: (batch, seq, d_model).
    B, S, d_model, d_ff = 2, 8, 16, 32
    x = jax.random.normal(k_x, (B, S, d_model), jnp.float32)
    w1, b1 = init_linear_params(k_w1, d_model, d_ff)
    w2, b2 = init_linear_params(k_w2, d_ff, d_model)

    # 1) f32, weight-resident path: exact check against pure-JAX reference
    #    (identity norm, no dropout).
    y = positionwise_feed_forward(x, w1, b1, w2, b2)
    y = jax.block_until_ready(y)
    y_ref = _ffn_ref(x, w1, b1, w2, b2)
    assert y.shape == (B, S, d_model)
    assert jnp.allclose(y, y_ref, atol=1e-5, rtol=1e-5)

    # 2) bf16 fast path (production config for v6e/v7x): f32 accumulate inside.
    xb, w1b, b1b, w2b, b2b = (t.astype(jnp.bfloat16)
                              for t in (x, w1, b1, w2, b2))
    yb = positionwise_feed_forward(xb, w1b, b1b, w2b, b2b)
    yb = jax.block_until_ready(yb)
    yb_ref = _ffn_ref(xb, w1b, b1b, w2b, b2b)
    assert yb.shape == (B, S, d_model)
    assert jnp.allclose(yb.astype(jnp.float32), yb_ref, atol=5e-2, rtol=5e-2)

    # 3) d_ff-slab fallback path (forced), bf16, with a real reduction over
    #    two hidden slabs and two row tiles: exercises the accumulator kernel.
    B3, S3, dm3, df3 = 2, 64, 128, 256
    x3 = jax.random.normal(k_x3, (B3, S3, dm3), jnp.float32).astype(jnp.bfloat16)
    w3, b3 = init_linear_params(k_w3, dm3, df3, jnp.bfloat16)
    w4, b4 = init_linear_params(k_w4, df3, dm3, jnp.bfloat16)
    y3 = positionwise_feed_forward(x3, w3, b3, w4, b4,
                                   tm=64, tf=128, force_slab=True)
    y3 = jax.block_until_ready(y3)
    y3_ref = _ffn_ref(x3, w3, b3, w4, b4)
    assert y3.shape == (B3, S3, dm3)
    assert jnp.allclose(y3.astype(jnp.float32), y3_ref, atol=5e-2, rtol=5e-2)

    print("KERNEL_OK")
</pallas_src>

<mosaic_0001>
module attributes {stable_mosaic.version = 11 : i64} {
  func.func @ffn_kernel_resident(%arg0: i32, %arg1: memref<8x16xf32, #tpu.memory_space<vmem>>, %arg2: memref<16x32xf32, #tpu.memory_space<vmem>>, %arg3: memref<1x32xf32, #tpu.memory_space<vmem>>, %arg4: memref<32x16xf32, #tpu.memory_space<vmem>>, %arg5: memref<1x16xf32, #tpu.memory_space<vmem>>, %arg6: memref<8x16xf32, #tpu.memory_space<vmem>>) attributes {dimension_semantics = [#tpu.dimension_semantics<parallel>], iteration_bounds = array<i64: 2>, scalar_prefetch = 0 : i64, scratch_operands = 0 : i64, tpu.core_type = #tpu.core_type<tc>, window_params = [{transform_indices = @transform_0, window_bounds = array<i64: 8, 16>}, {pipeline_mode = #tpu.pipeline_mode<synchronous>, transform_indices = @transform_1, window_bounds = array<i64: 16, 32>}, {pipeline_mode = #tpu.pipeline_mode<synchronous>, transform_indices = @transform_2, window_bounds = array<i64: 1, 32>}, {pipeline_mode = #tpu.pipeline_mode<synchronous>, transform_indices = @transform_3, window_bounds = array<i64: 32, 16>}, {pipeline_mode = #tpu.pipeline_mode<synchronous>, transform_indices = @transform_4, window_bounds = array<i64: 1, 16>}, {transform_indices = @transform_5, window_bounds = array<i64: 8, 16>}]} {
    %c0 = arith.constant 0 : index
    %c0_0 = arith.constant 0 : index
    %0 = vector.load %arg1[%c0, %c0_0] : memref<8x16xf32, #tpu.memory_space<vmem>>, vector<8x16xf32>
    %c0_1 = arith.constant 0 : index
    %c0_2 = arith.constant 0 : index
    %1 = vector.load %arg2[%c0_1, %c0_2] : memref<16x32xf32, #tpu.memory_space<vmem>>, vector<16x32xf32>
    %cst = arith.constant dense<0.000000e+00> : vector<8x32xf32>
    %2 = tpu.matmul %0, %1, %cst {dimension_numbers = #tpu.dot_dimension_numbers<[1], [0], [0], [1], [0, 0, 1, 1], [], []>} : vector<8x16xf32>, vector<16x32xf32>, vector<8x32xf32> -> vector<8x32xf32>
    %c0_3 = arith.constant 0 : index
    %c0_4 = arith.constant 0 : index
    %3 = vector.load %arg3[%c0_3, %c0_4] : memref<1x32xf32, #tpu.memory_space<vmem>>, vector<1x32xf32>
    %4 = vector.broadcast %3 : vector<1x32xf32> to vector<8x32xf32>
    %5 = arith.addf %2, %4 : vector<8x32xf32>
    %cst_5 = arith.constant 0.000000e+00 : f32
    %6 = vector.broadcast %cst_5 : f32 to vector<8x32xf32>
    %7 = arith.maximumf %5, %6 : vector<8x32xf32>
    %c0_6 = arith.constant 0 : index
    %c0_7 = arith.constant 0 : index
    %8 = vector.load %arg4[%c0_6, %c0_7] : memref<32x16xf32, #tpu.memory_space<vmem>>, vector<32x16xf32>
    %cst_8 = arith.constant dense<0.000000e+00> : vector<8x16xf32>
    %9 = tpu.matmul %7, %8, %cst_8 {dimension_numbers = #tpu.dot_dimension_numbers<[1], [0], [0], [1], [0, 0, 1, 1], [], []>} : vector<8x32xf32>, vector<32x16xf32>, vector<8x16xf32> -> vector<8x16xf32>
    %c0_9 = arith.constant 0 : index
    %c0_10 = arith.constant 0 : index
    %10 = vector.load %arg5[%c0_9, %c0_10] : memref<1x16xf32, #tpu.memory_space<vmem>>, vector<1x16xf32>
    %11 = vector.broadcast %10 : vector<1x16xf32> to vector<8x16xf32>
    %12 = arith.addf %9, %11 : vector<8x16xf32>
    %c0_11 = arith.constant 0 : index
    %c0_12 = arith.constant 0 : index
    %13 = vector.load %arg6[%c0_11, %c0_12] : memref<8x16xf32, #tpu.memory_space<vmem>>, vector<8x16xf32>
    tpu.vector_store %arg6[%c0_11, %c0_12], %12 {strides = array<i32>} : memref<8x16xf32, #tpu.memory_space<vmem>>, vector<8x16xf32>,
    return
  }
  func.func @transform_0(%arg0: i32) -> (i32, i32) {
    %c0_i32 = arith.constant 0 : i32
    %c0_i32_0 = arith.constant 0 : i32
    return %arg0, %c0_i32 : i32, i32
  }
  func.func @transform_1(%arg0: i32) -> (i32, i32) {
    %c0_i32 = arith.constant 0 : i32
    %c0_i32_0 = arith.constant 0 : i32
    %c0_i32_1 = arith.constant 0 : i32
    return %c0_i32, %c0_i32_0 : i32, i32
  }
  func.func @transform_2(%arg0: i32) -> (i32, i32) {
    %c0_i32 = arith.constant 0 : i32
    %c0_i32_0 = arith.constant 0 : i32
    %c0_i32_1 = arith.constant 0 : i32
    return %c0_i32, %c0_i32_0 : i32, i32
  }
  func.func @transform_3(%arg0: i32) -> (i32, i32) {
    %c0_i32 = arith.constant 0 : i32
    %c0_i32_0 = arith.constant 0 : i32
    %c0_i32_1 = arith.constant 0 : i32
    return %c0_i32, %c0_i32_0 : i32, i32
  }
  func.func @transform_4(%arg0: i32) -> (i32, i32) {
    %c0_i32 = arith.constant 0 : i32
    %c0_i32_0 = arith.constant 0 : i32
    %c0_i32_1 = arith.constant 0 : i32
    return %c0_i32, %c0_i32_0 : i32, i32
  }
  func.func @transform_5(%arg0: i32) -> (i32, i32) {
    %c0_i32 = arith.constant 0 : i32
    %c0_i32_0 = arith.constant 0 : i32
    return %arg0, %c0_i32 : i32, i32
  }
}

</mosaic_0001>

<bundles_post_ra>
// kernel: tpu_custom_call.1
= control target key start
LH: loop header
LB: loop body
LE: loop exit
PB: predicated region body
PF: predicated region fallthrough
CT: control target
= control target key end

     0   :  { %10 = vsyncpa [#allocation3], 0  ;;  %s618_s0 = inlined_call_operand.vmem [shape: f32[16,16], index: 0, kind: input, shape index: {}]   ;;  %s619_s1 = inlined_call_operand.vmem [shape: f32[16,32], index: 1, kind: input, shape index: {}]   ;;  %s620_s2 = inlined_call_operand.vmem [shape: f32[1,32], index: 2, kind: input, shape index: {}]   ;;  %s621_s3 = inlined_call_operand.vmem [shape: f32[32,16], index: 3, kind: input, shape index: {}]   ;;  %s622_s4 = inlined_call_operand.vmem [shape: f32[1,16], index: 4, kind: input, shape index: {}]   ;;  %s623_s5 = inlined_call_operand.hbm [shape: f32[16,16], index: 5, kind: output, shape index: {}]  }
   0x1   :  { %12 = vsyncpa [#allocation3 + $0x1], 0  ;;  %s507_s18 = smov 0   ;;  %s509_s19 = smov 0  }
   0x2   :  { %s511_s20 = smov 0   ;;  %s513_s21 = smov 0  }
   0x3 LB: > { %s528_s22 = sadd.s32 4294967295, %s475_s21   ;;  %s360_s23 = sadd.s32 4294967294, %s475_s21   ;;  %s475_s21 = sphi %s513_s21, %s629_s21   ;;  %s471_s20 = sphi %s511_s20, %s628_s20   ;;  %s467_s19 = sphi %s509_s19, %s627_s19   ;;  %s463_s18 = sphi %s507_s18, %s626_s18  }
   0x4   : > { %s532_s24 = sadd.s32 1, %s475_s21   ;;  %s135_s25 = sadd.s32 1, %s471_s20 }
   0x5   : > { %s132_s26 = ssub.s32 %s475_s21, %s532_s24  ;;  %p145_p0 = scmp.ne.s32.totalorder %s471_s20, %s467_s19 }
   0x6   : > { %p133_p1 = scmp.eq.s32.totalorder %s132_s26, 0  ;;  %p146_p2 = scmp.eq.s32.totalorder %s528_s22, 1 }
   0x7   : > { %p151_p3 = scmp.ne.s32.totalorder %s467_s19, %s463_s18  ;;  %p152_p4 = scmp.eq.s32.totalorder %s360_s23, 1 }
   0x8   : > { %s543_s27 = scalar_select %p133_p1, %s471_s20, %s135_s25  }
   0x9   : > { %p545_p5 = por %p146_p2, %p145_p0  ;;  %p549_p6 = por %p152_p4, %p151_p3 }
   0xa   : > { %p363_p7 = scmp.ge.s32.totalorder %s475_s21, 1  ;;  %p189_p8 = scmp.lt.s32.totalorder %s475_s21, 3 }
   0xc   : > { %p190_p9 = pnand %p363_p7, %p189_p8 }
   0xd   : > { %p216_p10 = scmp.lt.s32.totalorder (!%p190_p9), %s528_s22, 1  ;;  %s213_s8 = sand.u32 (!%p190_p9), 1, %s467_s19  }
   0xe   : > { %193 = sbr.rel (%p190_p9) target bundleno = 285 (0x11d), region = 40  ;;  %s364_s9 = sshll.u32 (!%p190_p9), %s213_s8, 3 }
   0xf   : > { %s369_s10 = sshll.u32 (!%p190_p9), %s528_s22, 3  ;;  %s215_s16 = scalar_lea.vmem (!%p190_p9), [#allocation2], %s364_s9 }
  0x10   : > { %s296_s13 = scalar_lea.hbm (!%p190_p9), %s623_s5, %s369_s10  ;;  %s298_s17 = sshll.u32 (!%p190_p9), %s215_s16, 4  ;;  %s299_s17 = int_to_ptr.vmem [resolvable:$true] %s298_s17 }
  0x11   : > { %s300_s23 = sshll.u32 (!%p190_p9), %s296_s13, 4  ;;  %s286_s25 = scalar_lea.sflag (!%p190_p9), [#allocation3], %s213_s8  ;;  %s301_s23 = int_to_ptr.hbm [resolvable:$true] %s300_s23 }
  0x12   : > { %s433_s7 = scalar_lea.hbm (!%p190_p9), %s623_s5, 16 }
  0x13   : > { %v222_v0 = vld [vmem:[%s619_s1 + $0x8] sm:$0xff]  ;;  %v221_v1 = vld [vmem:[%s619_s1] sm:$0xff]  ;;  %v255_v2 = vld [vmem:[%s621_s3 + $0x18] sm:$0xff]  ;;  %s217_s11 = scalar_select %p216_p10, %s528_s22, 1  ;;  %vm227_vm0 = vcmask 130048   ;;  %vm260_vm1 = vcmask 261120  }
  0x14   : > { %245 = vmatpush.msra.mxu0 %v222_v0  ;;  %276 = vmatpush.msra.mxu1 %v255_v2  ;;  %v254_v4 = vld [vmem:[%s621_s3 + $0x10] sm:$0xff]  ;;  %v253_v5 = vld [vmem:[%s621_s3 + $0x8] sm:$0xff]  ;;  %v252_v6 = vld [vmem:[%s621_s3] sm:$0xff]  ;;  %s427_s22 = sshra.s32 %s301_s23, 4  ;;  %s428_s22 = int_to_ptr.hbm [resolvable:$true] %s427_s22 }
  0x15   : > { %s365_s12 = sshll.u32 %s217_s11, 3  ;;  %v411_v7 = vld [vmem:[%s620_s2] ss:$0 sm:$0xff]  ;;  %s429_s26 = scalar_lea.hbm %s428_s22, 8 }
  0x16   : > { %246 = vmatpush.msra.mxu0 %v221_v1  ;;  %s219_s15 = scalar_lea.vmem %s618_s0, %s365_s12  ;;  %277 = vmatpush.msra.mxu1 %v254_v4  ;;  %v412_v11 = vld [vmem:[%s622_s4] ss:$0 sm:$0xff]  ;;  %p430_p11 = scmp.ne.s32.totalorder %s428_s22, %s429_s26 }
  0x17   : > { %v220_v3 = vld [vmem:[%s219_s15] sm:$0xff]  ;;  %p434_p0 = scmp.lt.s32.totalorder %s428_s22, %s623_s5  ;;  %p435_p1 = scmp.lt.s32.totalorder %s433_s7, %s429_s26 }
  0x18   : > { %366 = vmatmul.msk.f32.vlgmr.msra.gmra.mxu0 %vm227_vm0, %v220_v3  ;;  %278 = vmatpush.msra.mxu1 %v253_v5  ;;  %p431_p12 = pnand %p430_p11, %p545_p5 }
  0x19   : > { %p436_p2 = por %p435_p1, %p434_p0 }
  0x1a   : > { %279 = vmatpush.msra.mxu1 %v252_v6  ;;  %p432_p13 = pneg %p431_p12 }
  0x1c   : > { %p437_p3 = pnand %p436_p2, %p432_p13 }
  0x95   : > { %v248_v8 = vpop.f32.mrf.mxu0 }
  0x96   : > { %v249_v9 = vadd.f32 %v411_v7, %v248_v8 }
  0x98   : > { %v251_v10 = vmax.f32 %v249_v9, 0.0 }
  0x9a   : > { %367 = vmatmul.msk.f32.vlgmr.msra.gmra.mxu1 %vm260_vm1, %v251_v10 }
 0x117   : > { %v281_v12 = vpop.f32.mrf.mxu1 }
 0x118   : > { %v282_v13 = vadd.f32 %v412_v11, %v281_v12 }
 0x11a   : > { %284 = vst.msk [vmem:[%s215_s16] sm:$0xff] %vm227_vm0, %v282_v13 }
 0x11b   : > { %440 = shalt.err (!%p437_p3)
}
 0x11c   : > { %372 = dma.vmem_to_hbm [thread:$0]  (%p545_p5), %s299_s17, 128, %s301_s23, %s286_s25  }
 0x11d PF: > { %p378_p4 = scmp.ge.s32.totalorder %s475_s21, 2  ;;  %s312_s8 = sand.u32 1, %s463_s18  }
 0x11e   : > { %s313_s11 = scalar_lea.sflag [#allocation3], %s312_s8 }
 0x11f   : > { %p375_p7 = pnand %p378_p4, %p549_p6 }
 0x121   : > { %p376_p8 = pneg %p375_p7 }
 0x123   : > { %458 = dma.done.wait (%p376_p8), %s313_s11, 128  }
 0x124   : > { %460 = vsyncadd (%p376_p8), %s313_s11, 4294967168  ;;  %p15_p9 = scmp.ge.s32.totalorder %s532_s24, 4   ;;  %s626_s18 = smov %s467_s19 }
 0x125   : > { %s627_s19 = smov %s471_s20  ;;  %s628_s20 = smov %s543_s27 }
 0x126   : > { %s629_s21 = smov %s532_s24  ;;  %17 = sbr.rel (!%p15_p9) target bundleno = 3 (0x3), region = 75 }
 0x12b   :  { %319 = vsyncpa [#allocation3], 1 }
 0x12c   :  { %321 = vsyncpa [#allocation3 + $0x1], 1 }

</bundles_post_ra>
